<compile_context>
chip_gen: v7x
topology: tpu7x:2x2x1
jax: 0.10.0
libtpu: 0.0.40
codegen_flags: <defaults>
</compile_context>

<pallas_src>
import jax
import jax.numpy as jnp
from jax.experimental import pallas as pl
from jax.experimental.pallas import tpu as pltpu


def _swish_kernel(alpha_ref, beta_ref, x_ref, o_ref):
    # alpha/beta: (1, L) f32, resident in VMEM across all grid steps.
    # x: (tile_r, L) in the input dtype; compute in f32, cast at the store.
    x = x_ref[...].astype(jnp.float32)
    a = alpha_ref[...]                      # (1, L) -> broadcasts over rows
    b = beta_ref[...]                       # (1, L)
    bx = b * x
    # exp on EUP; exact reciprocal kept for numerical parity with the
    # PyTorch reference (approx=True would push the divide to vrcp, but the
    # kernel is HBM-bound so it makes no wall-clock difference).
    sig = pl.reciprocal(1.0 + jnp.exp(-bx))
    o_ref[...] = ((a * x) * sig).astype(o_ref.dtype)


def swish(x, alpha, beta):
    """y = alpha * x * sigmoid(beta * x); alpha, beta: (F,); x: (..., F)."""
    orig_shape = x.shape
    F = orig_shape[-1]
    assert alpha.shape == (F,) and beta.shape == (F,)

    a32 = alpha.astype(jnp.float32)
    b32 = beta.astype(jnp.float32)

    total = x.size
    # Lane-dense layout: when F < 128 and folds evenly into a 128-lane row,
    # pack 128 // F feature vectors per row so stores use all lanes.
    if (F % 128 != 0) and (128 % F == 0) and (total % 128 == 0):
        fold = 128 // F
        L = 128
        x2 = x.reshape(-1, L)
        a2 = jnp.tile(a32, fold).reshape(1, L)
        b2 = jnp.tile(b32, fold).reshape(1, L)
    else:
        L = F
        x2 = x.reshape(-1, F)
        a2 = a32.reshape(1, F)
        b2 = b32.reshape(1, F)

    R = x2.shape[0]
    itemsize = jnp.dtype(x2.dtype).itemsize

    # Row tile: target ~2 MiB per x block. With double-buffered x + out that
    # is ~8 MiB of VMEM -- safe under the scoped default on v5e/v6e/v7x.
    row_align = 8 if itemsize >= 4 else (16 if itemsize == 2 else 32)
    target_bytes = 2 * 1024 * 1024
    tile_r = target_bytes // max(1, L * itemsize)
    tile_r = max(row_align, min(tile_r, 1024))
    tile_r = max(row_align, (tile_r // row_align) * row_align)
    if R <= tile_r:
        tile_r = R  # single full-extent block (always a legal block shape)

    grid = (pl.cdiv(R, tile_r),)  # ragged last block handled by Pallas; no pad/slice

    out = pl.pallas_call(
        _swish_kernel,
        out_shape=jax.ShapeDtypeStruct((R, L), x2.dtype),
        grid_spec=pltpu.PrefetchScalarGridSpec(
            num_scalar_prefetch=0,
            grid=grid,
            in_specs=[
                pl.BlockSpec((1, L), lambda i: (0, 0)),        # alpha (resident)
                pl.BlockSpec((1, L), lambda i: (0, 0)),        # beta  (resident)
                pl.BlockSpec((tile_r, L), lambda i: (i, 0)),   # x row tile
            ],
            out_specs=pl.BlockSpec((tile_r, L), lambda i: (i, 0)),
        ),
        compiler_params=pltpu.CompilerParams(
            dimension_semantics=("parallel",),
        ),
    )(a2, b2, x2)

    return out.reshape(orig_shape)


if __name__ == "__main__":
    key = jax.random.PRNGKey(0)
    k1, k2, k3, k4 = jax.random.split(key, 4)

    def ref_fn(x, a, b):
        xf = x.astype(jnp.float32)
        return (a * xf * jax.nn.sigmoid(b * xf)).astype(x.dtype)

    # --- Case 1: module-sized input (batch=2, seq=8, hidden=32), f32.
    # Exercises the lane-dense fold path (F=32 -> 4 feature vectors per row).
    num_features = 32
    # Module init is constant (alpha=1.0, beta=1.702); add a small random
    # per-feature perturbation so the folded alpha/beta layout is verified.
    alpha = 1.0 + 0.1 * jax.random.normal(k3, (num_features,), dtype=jnp.float32)
    beta = 1.702 + 0.1 * jax.random.normal(k4, (num_features,), dtype=jnp.float32)

    x1 = jax.random.normal(k1, (2, 8, num_features), dtype=jnp.float32)
    y1 = jax.block_until_ready(swish(x1, alpha, beta))
    assert y1.shape == x1.shape and y1.dtype == x1.dtype
    assert jnp.max(jnp.abs(y1 - ref_fn(x1, alpha, beta))) < 1e-5

    # --- Case 2: larger input exercising multi-block grid with a ragged tail
    # (F multiple of 128 -> native layout, 1024-row tiles, 5 grid steps).
    F2 = 384
    alpha2 = jnp.full((F2,), 1.0, dtype=jnp.float32)
    beta2 = jnp.full((F2,), 1.702, dtype=jnp.float32)
    x2 = jax.random.normal(k2, (5000, F2), dtype=jnp.float32)
    y2 = jax.block_until_ready(swish(x2, alpha2, beta2))
    assert y2.shape == x2.shape and y2.dtype == x2.dtype
    assert jnp.max(jnp.abs(y2 - ref_fn(x2, alpha2, beta2))) < 1e-5

    print("KERNEL_OK")
</pallas_src>

<mosaic_0001>
module attributes {stable_mosaic.version = 11 : i64} {
  func.func @_swish_kernel(%arg0: i32, %arg1: memref<1x128xf32, #tpu.memory_space<vmem>>, %arg2: memref<1x128xf32, #tpu.memory_space<vmem>>, %arg3: memref<4x128xf32, #tpu.memory_space<vmem>>, %arg4: memref<4x128xf32, #tpu.memory_space<vmem>>) attributes {dimension_semantics = [#tpu.dimension_semantics<parallel>], iteration_bounds = array<i64: 1>, scalar_prefetch = 0 : i64, scratch_operands = 0 : i64, tpu.core_type = #tpu.core_type<tc>, window_params = [{pipeline_mode = #tpu.pipeline_mode<synchronous>, transform_indices = @transform_0, window_bounds = array<i64: 1, 128>}, {pipeline_mode = #tpu.pipeline_mode<synchronous>, transform_indices = @transform_1, window_bounds = array<i64: 1, 128>}, {transform_indices = @transform_2, window_bounds = array<i64: 4, 128>}, {transform_indices = @transform_3, window_bounds = array<i64: 4, 128>}]} {
    %c0 = arith.constant 0 : index
    %c0_0 = arith.constant 0 : index
    %0 = vector.load %arg3[%c0, %c0_0] : memref<4x128xf32, #tpu.memory_space<vmem>>, vector<4x128xf32>
    %c0_1 = arith.constant 0 : index
    %c0_2 = arith.constant 0 : index
    %1 = vector.load %arg1[%c0_1, %c0_2] : memref<1x128xf32, #tpu.memory_space<vmem>>, vector<1x128xf32>
    %c0_3 = arith.constant 0 : index
    %c0_4 = arith.constant 0 : index
    %2 = vector.load %arg2[%c0_3, %c0_4] : memref<1x128xf32, #tpu.memory_space<vmem>>, vector<1x128xf32>
    %3 = vector.broadcast %2 : vector<1x128xf32> to vector<4x128xf32>
    %4 = arith.mulf %3, %0 : vector<4x128xf32>
    %cst = arith.constant 0.000000e+00 : f32
    %5 = vector.broadcast %cst : f32 to vector<4x128xf32>
    %6 = arith.subf %5, %4 : vector<4x128xf32>
    %7 = math.exp %6 : vector<4x128xf32>
    %cst_5 = arith.constant 1.000000e+00 : f32
    %8 = vector.broadcast %cst_5 : f32 to vector<4x128xf32>
    %9 = arith.addf %8, %7 : vector<4x128xf32>
    %10 = tpu.reciprocal %9 : vector<4x128xf32> -> vector<4x128xf32>
    %11 = vector.broadcast %1 : vector<1x128xf32> to vector<4x128xf32>
    %12 = arith.mulf %11, %0 : vector<4x128xf32>
    %13 = arith.mulf %12, %10 : vector<4x128xf32>
    %c0_6 = arith.constant 0 : index
    %c0_7 = arith.constant 0 : index
    %14 = vector.load %arg4[%c0_6, %c0_7] : memref<4x128xf32, #tpu.memory_space<vmem>>, vector<4x128xf32>
    tpu.vector_store %arg4[%c0_6, %c0_7], %13 {strides = array<i32>} : memref<4x128xf32, #tpu.memory_space<vmem>>, vector<4x128xf32>,
    return
  }
  func.func @transform_0(%arg0: i32) -> (i32, i32) {
    %c0_i32 = arith.constant 0 : i32
    %c0_i32_0 = arith.constant 0 : i32
    %c0_i32_1 = arith.constant 0 : i32
    return %c0_i32, %c0_i32_0 : i32, i32
  }
  func.func @transform_1(%arg0: i32) -> (i32, i32) {
    %c0_i32 = arith.constant 0 : i32
    %c0_i32_0 = arith.constant 0 : i32
    %c0_i32_1 = arith.constant 0 : i32
    return %c0_i32, %c0_i32_0 : i32, i32
  }
  func.func @transform_2(%arg0: i32) -> (i32, i32) {
    %c0_i32 = arith.constant 0 : i32
    %c0_i32_0 = arith.constant 0 : i32
    return %arg0, %c0_i32 : i32, i32
  }
  func.func @transform_3(%arg0: i32) -> (i32, i32) {
    %c0_i32 = arith.constant 0 : i32
    %c0_i32_0 = arith.constant 0 : i32
    return %arg0, %c0_i32 : i32, i32
  }
}

</mosaic_0001>

<bundles_post_ra>
// kernel: tpu_custom_call.1
= control target key start
LH: loop header
LB: loop body
LE: loop exit
PB: predicated region body
PF: predicated region fallthrough
CT: control target
= control target key end

     0   :  { %8 = vsyncpa [#allocation3], 0  ;;  %s174_s0 = inlined_call_operand.hbm [shape: f32[1,128], index: 0, kind: input, shape index: {}]   ;;  %s175_s1 = inlined_call_operand.vmem [shape: f32[1,128], index: 1, kind: input, shape index: {}]   ;;  %s176_s2 = inlined_call_operand.vmem [shape: f32[4,128], index: 2, kind: input, shape index: {}]   ;;  %s177_s3 = inlined_call_operand.hbm [shape: f32[4,128], index: 3, kind: output, shape index: {}]  }
   0x1   :  { %9 = vsyncpa [#allocation4], 0  ;;  %s122_s12 = smov [#allocation2]   ;;  %s74_s16 = scalar_lea.hbm %s174_s0, 16 }
   0x2   :  { %s16_s13 = sshll.u32 %s122_s12, 4  ;;  %p75_p0 = scmp.ne.s32.totalorder %s174_s0, %s74_s16  ;;  %s17_s13 = int_to_ptr.vmem [resolvable:$true] %s16_s13 }
   0x3   :  { %p78_p1 = scmp.lt.u32.totalorder %s74_s16, %s174_s0 }
   0x5   :  { %p80_p2 = pnand %p78_p1, %p75_p0 }
   0x7   :  { %83 = shalt.err (!%p80_p2)
}
   0x8   :  { %s84_s21 = scalar_lea.vmem %s17_s13, 16  ;;  %s88_s22 = scalar_lea.vmem %s17_s13, 32 }
   0x9   :  { %p85_p3 = scmp.ne.s32.totalorder %s17_s13, %s84_s21  ;;  %p89_p4 = scmp.lt.s32.totalorder %s17_s13, %s17_s13 }
   0xa   :  { %p90_p5 = scmp.lt.s32.totalorder %s88_s22, %s84_s21 }
   0xc   :  { %p91_p6 = por %p90_p5, %p89_p4 }
   0xe   :  { %p92_p7 = pnand %p91_p6, %p85_p3 }
  0x10   :  { %95 = shalt.err (!%p92_p7)
}
  0x11   :  { %19 = dma.hbm_to_vmem [thread:$0]  %s174_s0, 16, %s17_s13, [#allocation3]  }
  0x12   :  { %118 = dma.done.wait [#allocation3], 16  }
  0x13   :  { %119 = vsyncadd [#allocation3], 4294967280  ;;  %v27_v0 = vld [vmem:[%s176_s2] sm:$0xf]  ;;  %v67_v7 = vld [vmem:[#allocation2] ss:$0 sm:$0xff] }
  0x14   :  { %v66_v1 = vld [vmem:[%s175_s1] ss:$0 sm:$0xff]  ;;  %v48_v8 = vmul.f32 %v67_v7, %v27_v0  ;;  %s123_s0 = smov [#allocation5]  }
  0x15   :  { %v36_v2 = vmul.f32 %v66_v1, %v27_v0  ;;  %s57_s29 = sshll.u32 %s123_s0, 4  ;;  %s58_s29 = int_to_ptr.vmem [resolvable:$true] %s57_s29 }
  0x16   :  { %s96_s2 = scalar_lea.vmem %s58_s29, 64  ;;  %p101_p9 = scmp.lt.s32.totalorder %s58_s29, %s58_s29 }
  0x17   :  { %v37_v3 = vsub.f32 0.0, %v36_v2  ;;  %p97_p8 = scmp.ne.s32.totalorder %s58_s29, %s96_s2  ;;  %p102_p10 = scmp.lt.s32.totalorder %s96_s2, %s96_s2 }
  0x19   :  { %v38_v4 = vmul.f32 1.442695, %v37_v3  ;;  %p103_p11 = por %p102_p10, %p101_p9 }
  0x1b   :  { %70 = vpow2.f32 %v38_v4  ;;  %p104_p12 = pnand %p103_p11, %p97_p8 }
  0x25   :  { %v71_v5 = vpop.eup %70 }
  0x26   :  { %v40_v6 = vadd.f32 1.0, %v71_v5 }
  0x28   :  { %72 = vrcp.f32 %v40_v6 }
  0x32   :  { %v73_v9 = vpop.eup %72 }
  0x33   :  { %v49_v10 = vmul.f32 %v73_v9, %v48_v8 }
  0x35   :  { %50 = vst [vmem:[#allocation5] sm:$0xf] %v49_v10 }
  0x36   :  { %107 = shalt.err (!%p104_p12)
}
  0x37   :  { %s108_s4 = scalar_lea.hbm %s177_s3, 64 }
  0x38   :  { %p109_p13 = scmp.ne.s32.totalorder %s177_s3, %s108_s4  ;;  %p112_p0 = scmp.lt.u32.totalorder %s108_s4, %s177_s3 }
  0x3a   :  { %p114_p1 = pnand %p112_p0, %p109_p13 }
  0x3c   :  { %117 = shalt.err (!%p114_p1)
}
  0x3d   :  { %60 = dma.vmem_to_hbm [thread:$0]  %s58_s29, 64, %s177_s3, [#allocation4]  }
  0x3e   :  { %120 = dma.done.wait [#allocation4], 64  }
  0x3f   :  { %121 = vsyncadd [#allocation4], 4294967232 }
  0x40   :  { %64 = vsyncpa [#allocation3], 1 }
  0x41   :  { %65 = vsyncpa [#allocation4], 1 }

</bundles_post_ra>
